<compile_context>
chip_gen: v6e
topology: v6e:2x2x1
jax: 0.10.0
libtpu: 0.0.40
codegen_flags: <defaults>
</compile_context>

<pallas_src>
import functools

import jax
import jax.numpy as jnp
from jax.experimental import pallas as pl
from jax.experimental.pallas import tpu as pltpu

_H1 = 64      # true hidden1 width
_H1P = 128    # padded hidden1 width (full vreg lane width)
_H2 = 32      # hidden2 width


def _round_up(n: int, m: int) -> int:
    return ((n + m - 1) // m) * m


def _mlp_kernel(x_ref, w1_ref, b1_ref, w2_ref, b2_ref, w3_ref, b3_ref, o_ref):
    # x_ref: (tile_b, d) tile of the batch (f32 or bf16)
    x = x_ref[...]

    # Layer 1: (tile_b, d) @ (d, 128) -> (tile_b, 128); bias/ReLU in f32 (v5e-safe).
    h1 = jnp.dot(x, w1_ref[...], preferred_element_type=jnp.float32) + b1_ref[...]
    h1 = jnp.maximum(h1, 0.0)

    # Layer 2: (tile_b, 128) @ (128, 32) -> (tile_b, 32). Padded rows of w2 are zero.
    h2 = jnp.dot(h1, w2_ref[...], preferred_element_type=jnp.float32) + b2_ref[...]
    h2 = jnp.maximum(h2, 0.0)

    # Layer 3, transposed so the result is lane-dense:
    #   (1, 32) @ (32, tile_b) -> (1, tile_b)   (XLU transpose + small MXU matmul)
    h2t = h2.T
    out = jnp.dot(w3_ref[...], h2t, preferred_element_type=jnp.float32) + b3_ref[...]

    o_ref[...] = out.astype(o_ref.dtype)


@functools.partial(jax.jit, static_argnames=("tile_b", "compute_dtype"))
def net_forward(x, w1, b1, w2, b2, w3, b3, *, tile_b=512, compute_dtype=jnp.float32):
    """Pallas implementation of Net.forward.

    x : (B, d) float32
    w1: (d, 64),  b1: (1, 64)
    w2: (64, 32), b2: (1, 32)
    w3: (32, 1),  b3: (1, 1)
    returns (B, 1) float32
    """
    B, d = x.shape
    itemsize = jnp.dtype(compute_dtype).itemsize

    # ---- choose the batch tile (multiple of 128, lane-dense output width) ----
    tb = max(128, min(tile_b, _round_up(B, 128)))
    tb = _round_up(tb, 128)
    # Conservative VMEM budget for the double-buffered x tile (v7x has only
    # 64 MiB physical / 32 MiB scoped VMEM per TensorCore).
    max_tile_bytes = 8 * 1024 * 1024
    max_rows = max(128, (max_tile_bytes // max(1, d * itemsize)) // 128 * 128)
    tb = min(tb, max_rows)

    B_pad = _round_up(B, tb)
    num_tiles = B_pad // tb

    # ---- pad / lay out parameters ----
    # hidden1 padded 64 -> 128 output columns (zeros), w2 padded with zero rows.
    w1p = jnp.zeros((d, _H1P), jnp.float32).at[:, :_H1].set(w1)
    b1p = jnp.zeros((1, _H1P), jnp.float32).at[:, :_H1].set(b1)
    w2p = jnp.zeros((_H1P, _H2), jnp.float32).at[:_H1, :].set(w2)
    w3t = w3.reshape(1, _H2)          # (32, 1) -> (1, 32)

    x_p = x
    if B_pad != B:
        x_p = jnp.pad(x, ((0, B_pad - B), (0, 0)))
    # bf16 halves HBM traffic of the dominant stream (x) and of w1; accumulation
    # stays f32 via preferred_element_type. Everything else remains f32.
    x_p = x_p.astype(compute_dtype)
    w1p = w1p.astype(compute_dtype)

    flops = 2 * B_pad * (d * _H1P + _H1P * _H2 + _H2)
    bytes_accessed = (B_pad * d * itemsize            # x
                      + d * _H1P * itemsize           # w1
                      + (_H1P + _H1P * _H2 + _H2 + _H2 + 1) * 4  # b1,w2,b2,w3,b3
                      + B_pad * 4)                    # output
    cost = pl.CostEstimate(flops=int(flops), transcendentals=0,
                           bytes_accessed=int(bytes_accessed))

    out = pl.pallas_call(
        _mlp_kernel,
        out_shape=jax.ShapeDtypeStruct((1, B_pad), jnp.float32),
        grid_spec=pltpu.PrefetchScalarGridSpec(
            num_scalar_prefetch=0,
            grid=(num_tiles,),
            in_specs=[
                # batch tile of the input
                pl.BlockSpec((tb, d), lambda i: (i, 0)),
                # weights / biases: full arrays, same block for every tile
                pl.BlockSpec((d, _H1P), lambda i: (0, 0)),
                pl.BlockSpec((1, _H1P), lambda i: (0, 0)),
                pl.BlockSpec((_H1P, _H2), lambda i: (0, 0)),
                pl.BlockSpec((1, _H2), lambda i: (0, 0)),
                pl.BlockSpec((1, _H2), lambda i: (0, 0)),
                pl.BlockSpec((1, 1), lambda i: (0, 0)),
            ],
            # lane-dense output slab: (1, tb) columns of the (1, B_pad) result
            out_specs=pl.BlockSpec((1, tb), lambda i: (0, i)),
        ),
        compiler_params=pltpu.CompilerParams(
            dimension_semantics=("parallel",),   # shard batch tiles across TCs (v7x)
            vmem_limit_bytes=32 * 1024 * 1024,
        ),
        cost_estimate=cost,
    )(x_p, w1p, b1p, w2p, b2, w3t, b3)

    return out.reshape(B_pad, 1)[:B]


def init_params(key, d):
    """Deterministic param init mimicking PyTorch nn.Linear default
    (uniform in +/- 1/sqrt(fan_in)).  Weights stored as (in, out)."""
    def linear(key, fan_in, fan_out):
        kw, kb = jax.random.split(key)
        bound = 1.0 / jnp.sqrt(fan_in)
        w = jax.random.uniform(kw, (fan_in, fan_out), jnp.float32, -bound, bound)
        b = jax.random.uniform(kb, (1, fan_out), jnp.float32, -bound, bound)
        return w, b

    k1, k2, k3 = jax.random.split(key, 3)
    w1, b1 = linear(k1, d, _H1)
    w2, b2 = linear(k2, _H1, _H2)
    w3, b3 = linear(k3, _H2, 1)
    return w1, b1, w2, b2, w3, b3


def reference_forward(x, w1, b1, w2, b2, w3, b3):
    h1 = jnp.maximum(x @ w1 + b1, 0.0)
    h2 = jnp.maximum(h1 @ w2 + b2, 0.0)
    return h2 @ w3 + b3


if __name__ == "__main__":
    key = jax.random.PRNGKey(0)
    kx, kp = jax.random.split(key)

    B, d = 8, 32
    x = jax.random.normal(kx, (B, d), jnp.float32)
    params = init_params(kp, d)

    # f32 path, tiny batch (padded up to one 128-row tile internally)
    out = jax.block_until_ready(net_forward(x, *params))
    ref = reference_forward(x, *params)
    assert out.shape == (B, 1), out.shape
    assert jnp.allclose(out, ref, atol=1e-5, rtol=1e-5), "mismatch vs. reference (f32)"

    # multi-tile + non-divisible batch (padding path), still f32
    B2 = 1000
    x2 = jax.random.normal(kx, (B2, d), jnp.float32)
    out2 = jax.block_until_ready(net_forward(x2, *params, tile_b=256))
    ref2 = reference_forward(x2, *params)
    assert out2.shape == (B2, 1), out2.shape
    assert jnp.allclose(out2, ref2, atol=1e-4, rtol=1e-4), "mismatch vs. reference (multi-tile)"

    # bf16 input path (x, w1 in bf16; f32 accumulation) — looser tolerance
    out3 = jax.block_until_ready(
        net_forward(x2, *params, tile_b=256, compute_dtype=jnp.bfloat16))
    assert out3.shape == (B2, 1), out3.shape
    assert jnp.allclose(out3, ref2, atol=1e-1, rtol=1e-1), "mismatch vs. reference (bf16)"

    print("KERNEL_OK")
</pallas_src>

<mosaic_0001>
module attributes {stable_mosaic.version = 11 : i64} {
  func.func @_mlp_kernel(%arg0: i32, %arg1: memref<128x32xf32, #tpu.memory_space<vmem>>, %arg2: memref<32x128xf32, #tpu.memory_space<vmem>>, %arg3: memref<1x128xf32, #tpu.memory_space<vmem>>, %arg4: memref<128x32xf32, #tpu.memory_space<vmem>>, %arg5: memref<1x32xf32, #tpu.memory_space<vmem>>, %arg6: memref<1x32xf32, #tpu.memory_space<vmem>>, %arg7: memref<1x1xf32, #tpu.memory_space<vmem>>, %arg8: memref<1x128xf32, #tpu.memory_space<vmem>>) attributes {dimension_semantics = [#tpu.dimension_semantics<parallel>], iteration_bounds = array<i64: 1>, scalar_prefetch = 0 : i64, scratch_operands = 0 : i64, tpu.core_type = #tpu.core_type<tc>, window_params = [{transform_indices = @transform_0, window_bounds = array<i64: 128, 32>}, {pipeline_mode = #tpu.pipeline_mode<synchronous>, transform_indices = @transform_1, window_bounds = array<i64: 32, 128>}, {pipeline_mode = #tpu.pipeline_mode<synchronous>, transform_indices = @transform_2, window_bounds = array<i64: 1, 128>}, {pipeline_mode = #tpu.pipeline_mode<synchronous>, transform_indices = @transform_3, window_bounds = array<i64: 128, 32>}, {pipeline_mode = #tpu.pipeline_mode<synchronous>, transform_indices = @transform_4, window_bounds = array<i64: 1, 32>}, {pipeline_mode = #tpu.pipeline_mode<synchronous>, transform_indices = @transform_5, window_bounds = array<i64: 1, 32>}, {pipeline_mode = #tpu.pipeline_mode<synchronous>, transform_indices = @transform_6, window_bounds = array<i64: 1, 1>}, {transform_indices = @transform_7, window_bounds = array<i64: 1, 128>}]} {
    %c0 = arith.constant 0 : index
    %c0_0 = arith.constant 0 : index
    %0 = vector.load %arg1[%c0, %c0_0] : memref<128x32xf32, #tpu.memory_space<vmem>>, vector<128x32xf32>
    %c0_1 = arith.constant 0 : index
    %c0_2 = arith.constant 0 : index
    %1 = vector.load %arg2[%c0_1, %c0_2] : memref<32x128xf32, #tpu.memory_space<vmem>>, vector<32x128xf32>
    %cst = arith.constant dense<0.000000e+00> : vector<128x128xf32>
    %2 = tpu.matmul %0, %1, %cst {dimension_numbers = #tpu.dot_dimension_numbers<[1], [0], [0], [1], [0, 0, 1, 1], [], []>} : vector<128x32xf32>, vector<32x128xf32>, vector<128x128xf32> -> vector<128x128xf32>
    %c0_3 = arith.constant 0 : index
    %c0_4 = arith.constant 0 : index
    %3 = vector.load %arg3[%c0_3, %c0_4] : memref<1x128xf32, #tpu.memory_space<vmem>>, vector<1x128xf32>
    %4 = vector.broadcast %3 : vector<1x128xf32> to vector<128x128xf32>
    %5 = arith.addf %2, %4 : vector<128x128xf32>
    %cst_5 = arith.constant 0.000000e+00 : f32
    %6 = vector.broadcast %cst_5 : f32 to vector<128x128xf32>
    %7 = arith.maximumf %5, %6 : vector<128x128xf32>
    %c0_6 = arith.constant 0 : index
    %c0_7 = arith.constant 0 : index
    %8 = vector.load %arg4[%c0_6, %c0_7] : memref<128x32xf32, #tpu.memory_space<vmem>>, vector<128x32xf32>
    %cst_8 = arith.constant dense<0.000000e+00> : vector<128x32xf32>
    %9 = tpu.matmul %7, %8, %cst_8 {dimension_numbers = #tpu.dot_dimension_numbers<[1], [0], [0], [1], [0, 0, 1, 1], [], []>} : vector<128x128xf32>, vector<128x32xf32>, vector<128x32xf32> -> vector<128x32xf32>
    %c0_9 = arith.constant 0 : index
    %c0_10 = arith.constant 0 : index
    %10 = vector.load %arg5[%c0_9, %c0_10] : memref<1x32xf32, #tpu.memory_space<vmem>>, vector<1x32xf32>
    %11 = vector.broadcast %10 : vector<1x32xf32> to vector<128x32xf32>
    %12 = arith.addf %9, %11 : vector<128x32xf32>
    %cst_11 = arith.constant 0.000000e+00 : f32
    %13 = vector.broadcast %cst_11 : f32 to vector<128x32xf32>
    %14 = arith.maximumf %12, %13 : vector<128x32xf32>
    %15 = tpu.transpose %14, [1, 0] : vector<128x32xf32> -> vector<32x128xf32>
    %c0_12 = arith.constant 0 : index
    %c0_13 = arith.constant 0 : index
    %16 = vector.load %arg6[%c0_12, %c0_13] : memref<1x32xf32, #tpu.memory_space<vmem>>, vector<1x32xf32>
    %cst_14 = arith.constant dense<0.000000e+00> : vector<1x128xf32>
    %17 = tpu.matmul %16, %15, %cst_14 {dimension_numbers = #tpu.dot_dimension_numbers<[1], [0], [0], [1], [0, 0, 1, 1], [], []>} : vector<1x32xf32>, vector<32x128xf32>, vector<1x128xf32> -> vector<1x128xf32>
    %c0_15 = arith.constant 0 : index
    %c0_16 = arith.constant 0 : index
    %18 = vector.load %arg7[%c0_15, %c0_16] : memref<1x1xf32, #tpu.memory_space<vmem>>, vector<1x1xf32>
    %19 = vector.broadcast %18 : vector<1x1xf32> to vector<1x128xf32>
    %20 = arith.addf %17, %19 : vector<1x128xf32>
    %c0_17 = arith.constant 0 : index
    %c0_18 = arith.constant 0 : index
    %21 = vector.load %arg8[%c0_17, %c0_18] : memref<1x128xf32, #tpu.memory_space<vmem>>, vector<1x128xf32>
    tpu.vector_store %arg8[%c0_17, %c0_18], %20 {strides = array<i32>} : memref<1x128xf32, #tpu.memory_space<vmem>>, vector<1x128xf32>,
    return
  }
  func.func @transform_0(%arg0: i32) -> (i32, i32) {
    %c0_i32 = arith.constant 0 : i32
    %c0_i32_0 = arith.constant 0 : i32
    return %arg0, %c0_i32 : i32, i32
  }
  func.func @transform_1(%arg0: i32) -> (i32, i32) {
    %c0_i32 = arith.constant 0 : i32
    %c0_i32_0 = arith.constant 0 : i32
    %c0_i32_1 = arith.constant 0 : i32
    return %c0_i32, %c0_i32_0 : i32, i32
  }
  func.func @transform_2(%arg0: i32) -> (i32, i32) {
    %c0_i32 = arith.constant 0 : i32
    %c0_i32_0 = arith.constant 0 : i32
    %c0_i32_1 = arith.constant 0 : i32
    return %c0_i32, %c0_i32_0 : i32, i32
  }
  func.func @transform_3(%arg0: i32) -> (i32, i32) {
    %c0_i32 = arith.constant 0 : i32
    %c0_i32_0 = arith.constant 0 : i32
    %c0_i32_1 = arith.constant 0 : i32
    return %c0_i32, %c0_i32_0 : i32, i32
  }
  func.func @transform_4(%arg0: i32) -> (i32, i32) {
    %c0_i32 = arith.constant 0 : i32
    %c0_i32_0 = arith.constant 0 : i32
    %c0_i32_1 = arith.constant 0 : i32
    return %c0_i32, %c0_i32_0 : i32, i32
  }
  func.func @transform_5(%arg0: i32) -> (i32, i32) {
    %c0_i32 = arith.constant 0 : i32
    %c0_i32_0 = arith.constant 0 : i32
    %c0_i32_1 = arith.constant 0 : i32
    return %c0_i32, %c0_i32_0 : i32, i32
  }
  func.func @transform_6(%arg0: i32) -> (i32, i32) {
    %c0_i32 = arith.constant 0 : i32
    %c0_i32_0 = arith.constant 0 : i32
    %c0_i32_1 = arith.constant 0 : i32
    return %c0_i32, %c0_i32_0 : i32, i32
  }
  func.func @transform_7(%arg0: i32) -> (i32, i32) {
    %c0_i32 = arith.constant 0 : i32
    %c0_i32_0 = arith.constant 0 : i32
    return %c0_i32, %arg0 : i32, i32
  }
}

</mosaic_0001>

<bundles_post_ra>
// kernel: net_forward.1
= control target key start
LH: loop header
LB: loop body
LE: loop exit
PB: predicated region body
PF: predicated region fallthrough
CT: control target
= control target key end

     0   :  { %vm55_vm0 = vcmask 261120   ;;  %vm818_vm1 = vmmov 0   ;;  %s1042_s1 = inlined_call_operand.vmem [shape: f32[32,128], index: 1, kind: input, shape index: {}]   ;;  %s1043_s0 = inlined_call_operand.vmem [shape: f32[128,32], index: 0, kind: input, shape index: {}]   ;;  %s1044_s3 = inlined_call_operand.vmem [shape: f32[128,32], index: 3, kind: input, shape index: {}]   ;;  %s1045_s2 = inlined_call_operand.vmem [shape: f32[1,128], index: 2, kind: input, shape index: {}]   ;;  %s1046_s6 = inlined_call_operand.<no memory space> [shape: f32[1,1], index: 6, kind: input, shape index: {}]   ;;  %s1047_s4 = inlined_call_operand.vmem [shape: f32[1,32], index: 4, kind: input, shape index: {}]   ;;  %s1048_s5 = inlined_call_operand.vmem [shape: f32[1,32], index: 5, kind: input, shape index: {}]   ;;  %s1049_s7 = inlined_call_operand.vmem [shape: f32[1,128], index: 7, kind: output, shape index: {}]  }
   0x1   :  { %v47_v0 = vld [vmem:[%s1042_s1 + $0x18] sm:$0xff]  ;;  %v46_v1 = vld [vmem:[%s1042_s1 + $0x10] sm:$0xff]  ;;  %v28_v2 = vld [vmem:[%s1043_s0] sm:$0xff] }
   0x2   :  { %690 = vmatprep.subr.mxu1 %v47_v0  ;;  %v45_v3 = vld [vmem:[%s1042_s1 + $0x8] sm:$0xff]  ;;  %698 = vmatprep.mubr.msk.f32.mxu1 %vm55_vm0, %v28_v2  ;;  %v44_v4 = vld [vmem:[%s1042_s1] sm:$0xff]  ;;  %v280_v6 = vld [vmem:[%s1044_s3 + $0x78] sm:$0xff] }
   0x3   :  { %691 = vmatpush3.msra.mxu1 %v47_v0  ;;  %v29_v5 = vld [vmem:[%s1043_s0 + $0x8] sm:$0xff]  ;;  %v30_v7 = vld [vmem:[%s1043_s0 + $0x10] sm:$0xff]  ;;  %v31_v9 = vld [vmem:[%s1043_s0 + $0x18] sm:$0xff] }
   0x4   :  { %692 = vmatprep.subr.mxu1 %v46_v1  ;;  %v279_v8 = vld [vmem:[%s1044_s3 + $0x70] sm:$0xff]  ;;  %v278_v10 = vld [vmem:[%s1044_s3 + $0x68] sm:$0xff]  ;;  %v32_v11 = vld [vmem:[%s1043_s0 + $0x20] sm:$0xff] }
   0x5   :  { %693 = vmatpush3.msra.mxu1 %v46_v1  ;;  %v277_v12 = vld [vmem:[%s1044_s3 + $0x60] sm:$0xff]  ;;  %v33_v13 = vld [vmem:[%s1043_s0 + $0x28] sm:$0xff]  ;;  %v276_v14 = vld [vmem:[%s1044_s3 + $0x58] sm:$0xff] }
   0x6   :  { %694 = vmatprep.subr.mxu1 %v45_v3  ;;  %v34_v15 = vld [vmem:[%s1043_s0 + $0x30] sm:$0xff]  ;;  %v35_v17 = vld [vmem:[%s1043_s0 + $0x38] sm:$0xff]  ;;  %v274_v18 = vld [vmem:[%s1044_s3 + $0x48] sm:$0xff] }
   0x7   :  { %695 = vmatpush3.msra.mxu1 %v45_v3  ;;  %v275_v16 = vld [vmem:[%s1044_s3 + $0x50] sm:$0xff]  ;;  %v36_v19 = vld [vmem:[%s1043_s0 + $0x40] sm:$0xff]  ;;  %v37_v21 = vld [vmem:[%s1043_s0 + $0x48] sm:$0xff] }
   0x8   :  { %696 = vmatprep.subr.mxu1 %v44_v4  ;;  %v273_v20 = vld [vmem:[%s1044_s3 + $0x40] sm:$0xff]  ;;  %v272_v22 = vld [vmem:[%s1044_s3 + $0x38] sm:$0xff]  ;;  %v38_v23 = vld [vmem:[%s1043_s0 + $0x50] sm:$0xff] }
   0x9   :  { %697 = vmatpush3.msra.mxu1 %v44_v4  ;;  %v271_v24 = vld [vmem:[%s1044_s3 + $0x30] sm:$0xff]  ;;  %v39_v25 = vld [vmem:[%s1043_s0 + $0x58] sm:$0xff]  ;;  %v270_v26 = vld [vmem:[%s1044_s3 + $0x28] sm:$0xff] }
   0xa   :  { %699 = vmatmul.mubr.msk.f32.vlgmr.msra.gmra.mxu1 %vm55_vm0, %v29_v5  ;;  %722 = vmatprep.subr.mxu1 %v280_v6  ;;  %v40_v27 = vld [vmem:[%s1043_s0 + $0x60] sm:$0xff]  ;;  %v41_v29 = vld [vmem:[%s1043_s0 + $0x68] sm:$0xff]  ;;  %v268_v30 = vld [vmem:[%s1044_s3 + $0x18] sm:$0xff] }
   0xb   :  { %701 = vmatprep.mubr.msk.f32.mxu1 %vm55_vm0, %v30_v7  ;;  %723 = vmatpush3.msra.mxu1 %v280_v6  ;;  %v269_v28 = vld [vmem:[%s1044_s3 + $0x20] sm:$0xff]  ;;  %v42_v31 = vld [vmem:[%s1043_s0 + $0x70] sm:$0xff]  ;;  %v43_v32 = vld [vmem:[%s1043_s0 + $0x78] sm:$0xff] }
   0xc   :  { %724 = vmatprep.subr.mxu1 %v279_v8  ;;  %v267_v33 = vld [vmem:[%s1044_s3 + $0x10] sm:$0xff]  ;;  %v266_v34 = vld [vmem:[%s1044_s3 + $0x8] sm:$0xff]  ;;  %v265_v35 = vld [vmem:[%s1044_s3] sm:$0xff] }
   0xd   :  { %725 = vmatpush3.msra.mxu1 %v279_v8  ;;  %v586_v36 = vld [vmem:[%s1045_s2] ss:$0 sm:$0xff] }
   0xe   :  { %702 = vmatmul.mubr.msk.f32.gmra.mxu1 %vm55_vm0, %v31_v9  ;;  %726 = vmatprep.subr.mxu1 %v278_v10 }
   0xf   :  { %704 = vmatprep.mubr.msk.f32.mxu1 %vm55_vm0, %v32_v11  ;;  %727 = vmatpush3.msra.mxu1 %v278_v10 }
  0x10   :  { %728 = vmatprep.subr.mxu1 %v277_v12 }
  0x11   :  { %729 = vmatpush3.msra.mxu1 %v277_v12 }
  0x12   :  { %705 = vmatmul.mubr.msk.f32.gmra.mxu1 %vm55_vm0, %v33_v13  ;;  %730 = vmatprep.subr.mxu1 %v276_v14 }
  0x13   :  { %707 = vmatprep.mubr.msk.f32.mxu1 %vm55_vm0, %v34_v15  ;;  %731 = vmatpush3.msra.mxu1 %v276_v14 }
  0x14   :  { %732 = vmatprep.subr.mxu1 %v275_v16 }
  0x15   :  { %733 = vmatpush3.msra.mxu1 %v275_v16 }
  0x16   :  { %708 = vmatmul.mubr.msk.f32.gmra.mxu1 %vm55_vm0, %v35_v17  ;;  %734 = vmatprep.subr.mxu1 %v274_v18 }
  0x17   :  { %710 = vmatprep.mubr.msk.f32.mxu1 %vm55_vm0, %v36_v19  ;;  %735 = vmatpush3.msra.mxu1 %v274_v18 }
  0x18   :  { %736 = vmatprep.subr.mxu1 %v273_v20 }
  0x19   :  { %737 = vmatpush3.msra.mxu1 %v273_v20 }
  0x1a   :  { %711 = vmatmul.mubr.msk.f32.gmra.mxu1 %vm55_vm0, %v37_v21  ;;  %738 = vmatprep.subr.mxu1 %v272_v22  ;;  %v817_v21 = vmov 0.0  }
  0x1b   :  { %713 = vmatprep.mubr.msk.f32.mxu1 %vm55_vm0, %v38_v23  ;;  %739 = vmatpush3.msra.mxu1 %v272_v22  ;;  %v819_v22 = vmov 0   ;;  %v12_v23 = vstv %s1046_s6 }
  0x1c   :  { %740 = vmatprep.subr.mxu1 %v271_v24  ;;  %778 = vmatprep.subr.mxu0 %v817_v21  ;;  %13 = vst [vmem:[#allocation2] sm:$0x1] %v12_v23 }
  0x1d   :  { %741 = vmatpush3.msra.mxu1 %v271_v24  ;;  %810 = vmatprep.mubr.msk.f32.mxu0 %vm818_vm1, %v817_v21 }
  0x1e   :  { %714 = vmatmul.mubr.msk.f32.gmra.mxu1 %vm55_vm0, %v39_v25  ;;  %742 = vmatprep.subr.mxu1 %v270_v26 }
  0x1f   :  { %716 = vmatprep.mubr.msk.f32.mxu1 %vm55_vm0, %v40_v27  ;;  %743 = vmatpush3.msra.mxu1 %v270_v26 }
  0x20   :  { %744 = vmatprep.subr.mxu1 %v269_v28  ;;  %816 = vset.pattern.permute.xlu0 %v819_v22 }
  0x21   :  { %745 = vmatpush3.msra.mxu1 %v269_v28 }
  0x22   :  { %717 = vmatmul.mubr.msk.f32.gmra.mxu1 %vm55_vm0, %v41_v29  ;;  %746 = vmatprep.subr.mxu1 %v268_v30 }
  0x23   :  { %719 = vmatprep.mubr.msk.f32.mxu1 %vm55_vm0, %v42_v31  ;;  %747 = vmatpush3.msra.mxu1 %v268_v30  ;;  %v450_v24 = vld [vmem:[#allocation2] sm:$0x1] }
  0x24   :  { %748 = vmatprep.subr.mxu1 %v267_v33  ;;  %453 = vperm.xlu0 %816, %v450_v24  }
  0x25   :  { %749 = vmatpush3.msra.mxu1 %v267_v33 }
  0x26   :  { %720 = vmatmul.mubr.msk.f32.gmra.mxu1 %vm55_vm0, %v43_v32  ;;  %750 = vmatprep.subr.mxu1 %v266_v34 }
  0x27   :  { %751 = vmatpush3.msra.mxu1 %v266_v34 }
  0x28   :  { %752 = vmatprep.subr.mxu1 %v265_v35 }
  0x29   :  { %753 = vmatpush3.msra.mxu1 %v265_v35 }
  0xca   :  { %v700_v37 = vpop.f32.mrf.mxu1 }
  0xcb   :  { %v176_v38 = vadd.f32 %v700_v37, %v586_v36 }
  0xcc   :  { %v170_v39 = vpop.f32.mrf.mxu1 }
  0xcd   :  { %v171_v40 = vadd.f32 %v586_v36, %v170_v39  ;;  %v250_v43 = vmax.f32 %v176_v38, 0.0  ;;  %v603_v39 = vld [vmem:[%s1047_s4] ss:$0 sm:$0xff] }
  0xce   :  { %v703_v41 = vpop.f32.mrf.mxu1 }
  0xcf   :  { %v249_v42 = vmax.f32 %v171_v40, 0.0  ;;  %v186_v44 = vadd.f32 %v703_v41, %v586_v36 }
  0xd0   :  { %v180_v45 = vpop.f32.mrf.mxu1 }
  0xd1   :  { %v181_v46 = vadd.f32 %v586_v36, %v180_v45  ;;  %754 = vmatprep.mubr.f32.mxu1 %v249_v42  ;;  %v252_v49 = vmax.f32 %v186_v44, 0.0 }
  0xd2   :  { %v706_v47 = vpop.f32.mrf.mxu1  ;;  %755 = vmatmul.mubr.f32.vlgmr.msra.gmra.mxu1 %v250_v43 }
  0xd3   :  { %v251_v48 = vmax.f32 %v181_v46, 0.0  ;;  %v196_v50 = vadd.f32 %v706_v47, %v586_v36 }
  0xd4   :  { %v190_v51 = vpop.f32.mrf.mxu1 }
  0xd5   :  { %v191_v52 = vadd.f32 %v586_v36, %v190_v51  ;;  %757 = vmatprep.mubr.f32.mxu1 %v251_v48  ;;  %v254_v55 = vmax.f32 %v196_v50, 0.0 }
  0xd6   :  { %v709_v53 = vpop.f32.mrf.mxu1  ;;  %758 = vmatmul.mubr.f32.gmra.mxu1 %v252_v49 }
  0xd7   :  { %v253_v54 = vmax.f32 %v191_v52, 0.0  ;;  %v206_v56 = vadd.f32 %v709_v53, %v586_v36 }
  0xd8   :  { %v200_v57 = vpop.f32.mrf.mxu1 }
  0xd9   :  { %v201_v58 = vadd.f32 %v586_v36, %v200_v57  ;;  %760 = vmatprep.mubr.f32.mxu1 %v253_v54  ;;  %v256_v61 = vmax.f32 %v206_v56, 0.0 }
  0xda   :  { %v712_v59 = vpop.f32.mrf.mxu1  ;;  %761 = vmatmul.mubr.f32.gmra.mxu1 %v254_v55 }
  0xdb   :  { %v255_v60 = vmax.f32 %v201_v58, 0.0  ;;  %v216_v62 = vadd.f32 %v712_v59, %v586_v36 }
  0xdc   :  { %v210_v63 = vpop.f32.mrf.mxu1 }
  0xdd   :  { %v211_v0 = vadd.f32 %v586_v36, %v210_v63  ;;  %763 = vmatprep.mubr.f32.mxu1 %v255_v60  ;;  %v258_v3 = vmax.f32 %v216_v62, 0.0 }
  0xde   :  { %v715_v1 = vpop.f32.mrf.mxu1  ;;  %764 = vmatmul.mubr.f32.gmra.mxu1 %v256_v61 }
  0xdf   :  { %v257_v2 = vmax.f32 %v211_v0, 0.0  ;;  %v226_v4 = vadd.f32 %v715_v1, %v586_v36 }
  0xe0   :  { %v220_v5 = vpop.f32.mrf.mxu1 }
  0xe1   :  { %v221_v6 = vadd.f32 %v586_v36, %v220_v5  ;;  %766 = vmatprep.mubr.f32.mxu1 %v257_v2  ;;  %v260_v9 = vmax.f32 %v226_v4, 0.0 }
  0xe2   :  { %v718_v7 = vpop.f32.mrf.mxu1  ;;  %767 = vmatmul.mubr.f32.gmra.mxu1 %v258_v3 }
  0xe3   :  { %v259_v8 = vmax.f32 %v221_v6, 0.0  ;;  %v236_v10 = vadd.f32 %v718_v7, %v586_v36 }
  0xe4   :  { %v230_v11 = vpop.f32.mrf.mxu1 }
  0xe5   :  { %v231_v12 = vadd.f32 %v586_v36, %v230_v11  ;;  %769 = vmatprep.mubr.f32.mxu1 %v259_v8  ;;  %v262_v15 = vmax.f32 %v236_v10, 0.0  ;;  %v449_v10 = vld [vmem:[%s1048_s5] sm:$0x1]  ;;  %v456_v11 = vlaneseq }
  0xe6   :  { %v721_v13 = vpop.f32.mrf.mxu1  ;;  %770 = vmatmul.mubr.f32.gmra.mxu1 %v260_v9 }
  0xe7   :  { %v261_v14 = vmax.f32 %v231_v12, 0.0  ;;  %v246_v16 = vadd.f32 %v721_v13, %v586_v36  ;;  %v457_v12 = vshrl.u32 %v456_v11, 7 }
  0xe8   :  { %v240_v17 = vpop.f32.mrf.mxu1 }
  0xe9   :  { %v241_v18 = vadd.f32 %v586_v36, %v240_v17  ;;  %772 = vmatprep.mubr.f32.mxu1 %v261_v14  ;;  %v264_v20 = vmax.f32 %v246_v16, 0.0  ;;  %v458_v13 = vsub.s32 0, %v457_v12  ;;  %v454_v14 = vpop.permute.xlu0 %453 }
  0xea   :  { %773 = vmatmul.mubr.f32.gmra.mxu1 %v262_v15 }
  0xeb   :  { %v263_v19 = vmax.f32 %v241_v18, 0.0  ;;  %v459_v15 = vrot.slane %v454_v14, %v458_v13 }
  0xed   :  { %775 = vmatprep.mubr.f32.mxu1 %v263_v19 }
  0xee   :  { %776 = vmatmul.mubr.f32.gmra.mxu1 %v264_v20 }
 0x192   :  { %v992_v25 = vpop.f32.mrf.mxu1 }
 0x193   :  { %v360_v5 = vadd.f32 %v992_v25, %v603_v39 }
 0x194   :  { %v994_v26 = vpop.f32.mrf.mxu1 }
 0x195   :  { %v434_v7 = vmax.f32 %v360_v5, 0.0  ;;  %v355_v8 = vadd.f32 %v603_v39, %v994_v26 }
 0x196   :  { %v759_v27 = vpop.f32.mrf.mxu1 }
 0x197   :  { %v370_v1 = vadd.f32 %v759_v27, %v603_v39  ;;  %v433_v9 = vmax.f32 %v355_v8, 0.0 }
 0x198   :  { %v996_v28 = vpop.f32.mrf.mxu1 }
 0x199   :  { %v436_v3 = vmax.f32 %v370_v1, 0.0  ;;  %v365_v4 = vadd.f32 %v603_v39, %v996_v28 }
 0x19a   :  { %v762_v29 = vpop.f32.mrf.mxu1 }
 0x19b   :  { %v380_v61 = vadd.f32 %v762_v29, %v603_v39  ;;  %v435_v6 = vmax.f32 %v365_v4, 0.0 }
 0x19c   :  { %v374_v30 = vpop.f32.mrf.mxu1 }
 0x19d   :  { %v438_v63 = vmax.f32 %v380_v61, 0.0  ;;  %v375_v0 = vadd.f32 %v603_v39, %v374_v30 }
 0x19e   :  { %v765_v31 = vpop.f32.mrf.mxu1 }
 0x19f   :  { %v390_v57 = vadd.f32 %v765_v31, %v603_v39  ;;  %v437_v2 = vmax.f32 %v375_v0, 0.0 }
 0x1a0   :  { %v384_v32 = vpop.f32.mrf.mxu1 }
 0x1a1   :  { %v440_v59 = vmax.f32 %v390_v57, 0.0  ;;  %v385_v60 = vadd.f32 %v603_v39, %v384_v32 }
 0x1a2   :  { %v768_v33 = vpop.f32.mrf.mxu1 }
 0x1a3   :  { %v400_v53 = vadd.f32 %v768_v33, %v603_v39  ;;  %v439_v62 = vmax.f32 %v385_v60, 0.0 }
 0x1a4   :  { %v394_v34 = vpop.f32.mrf.mxu1 }
 0x1a5   :  { %v442_v55 = vmax.f32 %v400_v53, 0.0  ;;  %v395_v56 = vadd.f32 %v603_v39, %v394_v34 }
 0x1a6   :  { %v771_v35 = vpop.f32.mrf.mxu1 }
 0x1a7   :  { %v410_v49 = vadd.f32 %v771_v35, %v603_v39  ;;  %v441_v58 = vmax.f32 %v395_v56, 0.0 }
 0x1a8   :  { %v404_v36 = vpop.f32.mrf.mxu1 }
 0x1a9   :  { %v444_v51 = vmax.f32 %v410_v49, 0.0  ;;  %v405_v52 = vadd.f32 %v603_v39, %v404_v36 }
 0x1aa   :  { %v774_v37 = vpop.f32.mrf.mxu1 }
 0x1ab   :  { %v420_v45 = vadd.f32 %v774_v37, %v603_v39  ;;  %v443_v54 = vmax.f32 %v405_v52, 0.0 }
 0x1ac   :  { %v414_v38 = vpop.f32.mrf.mxu1 }
 0x1ad   :  { %v446_v47 = vmax.f32 %v420_v45, 0.0  ;;  %v415_v48 = vadd.f32 %v603_v39, %v414_v38 }
 0x1ae   :  { %v777_v40 = vpop.f32.mrf.mxu1 }
 0x1af   :  { %v430_v41 = vadd.f32 %v777_v40, %v603_v39  ;;  %v445_v50 = vmax.f32 %v415_v48, 0.0 }
 0x1b0   :  { %v424_v42 = vpop.f32.mrf.mxu1 }
 0x1b1   :  { %v448_v43 = vmax.f32 %v430_v41, 0.0  ;;  %v425_v44 = vadd.f32 %v603_v39, %v424_v42 }
 0x1b3   :  { %779 = vmatpush3.xpose.msk.msra.mxu0 %vm55_vm0, %v448_v43  ;;  %v447_v46 = vmax.f32 %v425_v44, 0.0 }
 0x1b4   :  { %780 = vmatprep.subr.mxu0 %v817_v21 }
 0x1b7   :  { %781 = vmatpush3.xpose.msk.msra.mxu0 %vm55_vm0, %v447_v46 }
 0x1b8   :  { %782 = vmatprep.subr.mxu0 %v817_v21 }
 0x1bb   :  { %783 = vmatpush3.xpose.msk.msra.mxu0 %vm55_vm0, %v446_v47 }
 0x1bc   :  { %784 = vmatprep.subr.mxu0 %v817_v21 }
 0x1bf   :  { %785 = vmatpush3.xpose.msk.msra.mxu0 %vm55_vm0, %v445_v50 }
 0x1c0   :  { %786 = vmatprep.subr.mxu0 %v817_v21 }
 0x1c3   :  { %787 = vmatpush3.xpose.msk.msra.mxu0 %vm55_vm0, %v444_v51 }
 0x1c4   :  { %788 = vmatprep.subr.mxu0 %v817_v21 }
 0x1c7   :  { %789 = vmatpush3.xpose.msk.msra.mxu0 %vm55_vm0, %v443_v54 }
 0x1c8   :  { %790 = vmatprep.subr.mxu0 %v817_v21 }
 0x1cb   :  { %791 = vmatpush3.xpose.msk.msra.mxu0 %vm55_vm0, %v442_v55 }
 0x1cc   :  { %792 = vmatprep.subr.mxu0 %v817_v21 }
 0x1cf   :  { %793 = vmatpush3.xpose.msk.msra.mxu0 %vm55_vm0, %v441_v58 }
 0x1d0   :  { %794 = vmatprep.subr.mxu0 %v817_v21 }
 0x1d3   :  { %795 = vmatpush3.xpose.msk.msra.mxu0 %vm55_vm0, %v440_v59 }
 0x1d4   :  { %796 = vmatprep.subr.mxu0 %v817_v21 }
 0x1d7   :  { %797 = vmatpush3.xpose.msk.msra.mxu0 %vm55_vm0, %v439_v62 }
 0x1d8   :  { %798 = vmatprep.subr.mxu0 %v817_v21 }
 0x1db   :  { %799 = vmatpush3.xpose.msk.msra.mxu0 %vm55_vm0, %v438_v63 }
 0x1dc   :  { %800 = vmatprep.subr.mxu0 %v817_v21 }
 0x1df   :  { %801 = vmatpush3.xpose.msk.msra.mxu0 %vm55_vm0, %v437_v2 }
 0x1e0   :  { %802 = vmatprep.subr.mxu0 %v817_v21 }
 0x1e3   :  { %803 = vmatpush3.xpose.msk.msra.mxu0 %vm55_vm0, %v436_v3 }
 0x1e4   :  { %804 = vmatprep.subr.mxu0 %v817_v21 }
 0x1e7   :  { %805 = vmatpush3.xpose.msk.msra.mxu0 %vm55_vm0, %v435_v6 }
 0x1e8   :  { %806 = vmatprep.subr.mxu0 %v817_v21 }
 0x1eb   :  { %807 = vmatpush3.xpose.msk.msra.mxu0 %vm55_vm0, %v434_v7 }
 0x1ec   :  { %808 = vmatprep.subr.mxu0 %v817_v21 }
 0x1ef   :  { %809 = vmatpush3.xpose.msk.msra.mxu0 %vm55_vm0, %v433_v9 }
 0x1f2   :  { %811 = vmatmul.mubr.msk.f32.vlgmr.msra.gmra.mxu0 %vm55_vm0, %v449_v10 }
 0x2b2   :  { %v577_v16 = vpop.f32.mrf.mxu0 }
 0x2b3   :  { %v578_v17 = vadd.f32 %v577_v16, %v459_v15 }
 0x2b4   :  { %v812_v18 = vpop.f32.mrf.mxu0 }
 0x2b5   :  { %581 = vst [vmem:[%s1049_s7] sm:$0x1] %v578_v17 }

</bundles_post_ra>
